<compile_context>
chip_gen: v7x
topology: tpu7x:2x2x1
jax: 0.10.0
libtpu: 0.0.40
codegen_flags: <defaults>
</compile_context>

<pallas_src>
import jax
import jax.numpy as jnp
from jax.experimental import pallas as pl
from jax.experimental.pallas import tpu as pltpu


def _round_up(n, m):
    return ((n + m - 1) // m) * m


def lstm_kernel(x2_ref, wx_ref, wh_ref, b_ref, out_ref):
    """Full-sequence LSTM, everything resident in VMEM, no grid.

    x2_ref:  (T*B, F)   fp32 inputs, t-major flatten (t-major, b-minor)
    wx_ref:  (F, GP)    fp32 input->gate weights, packed gate axis [i|f|g|o]
    wh_ref:  (H, GP)    bf16 hidden->gate weights (serial critical path)
    b_ref:   (1, GP)    fp32 packed bias
    out_ref: (T, B, HP) fp32 lane-dense (padded) hidden states, t-major
    """
    T, B, HP = out_ref.shape
    GP = wx_ref.shape[1]
    H = wh_ref.shape[0]

    # ---- Phase 1: hoisted input projection (one MXU matmul, bias folded) ------
    # (T*B, F) x (F, GP) = 8 vregs at these shapes -> kept in values, no scratch.
    xp = jnp.dot(x2_ref[...], wx_ref[...],
                 preferred_element_type=jnp.float32) + b_ref[...]       # (T*B, GP)

    # ---- Phase 2: serial recurrence; only h @ Wh is on the critical path ------
    # Load the recurrent weight ONCE.  The loop below is fully unrolled with this
    # same static RHS, so Mosaic can keep the (H, GP) bf16 tile staged in the MXU
    # (weight-stationary) instead of re-pushing it every timestep.
    wh = wh_ref[...]                                                    # (H, GP) bf16

    h_bf = jnp.zeros((B, H), jnp.bfloat16)   # LSTMLayer.init_state -> zeros
    c = jnp.zeros((B, H), jnp.float32)
    pad = jnp.zeros((B, HP - H), jnp.float32) if HP > H else None

    # T is small & static: plain Python loop == fully unrolled, all indices static.
    # (For long T, switch to lax.fori_loop over the t-major buffer and drive the
    #  MXU explicitly with pltpu.matmul_push_rhs / matmul_acc_lhs.)
    for t in range(T):
        gates = xp[t * B:(t + 1) * B, :] + jnp.dot(
            h_bf, wh, preferred_element_type=jnp.float32)               # (B, GP)

        # One EUP tanh pass gives sigmoid for the i/f/o lanes of the packed vreg.
        sg = 0.5 * (1.0 + jnp.tanh(0.5 * gates))
        i_gate = sg[:, 0 * H:1 * H]
        f_gate = sg[:, 1 * H:2 * H]
        o_gate = sg[:, 3 * H:4 * H]
        g_gate = jnp.tanh(gates[:, 2 * H:3 * H])                        # cell gate

        c = c * f_gate + i_gate * g_gate
        h = o_gate * jnp.tanh(c)
        h_bf = h.astype(jnp.bfloat16)

        # Lane-dense, unmasked full-width store into the t-major padded output.
        if pad is None:
            out_ref[t, :, :] = h
        else:
            out_ref[t, :, :] = jnp.concatenate([h, pad], axis=-1)


def lstm_forward(x, wx, wh, b):
    """x: (B, T, F); wx: (F, 4H); wh: (H, 4H); b: (1, 4H)  ->  (B, T, H).

    Packed gate order on the 4H axis is [input, forget, cell, output]; wx/wh are
    the input / hidden halves of each LSTMLayer nn.Linear weight (transposed),
    b the biases.  Initial (h, c) state is zeros (LSTMLayer.init_state).
    """
    B, T, F = x.shape
    H = wx.shape[1] // 4
    GP = _round_up(4 * H, 128)   # packed gate axis, padded as a whole (no pad at H=32)
    HP = _round_up(H, 128)       # lane-dense output width

    wxp = jnp.pad(wx, ((0, 0), (0, GP - 4 * H))).astype(jnp.float32)          # (F, GP)
    whp = jnp.pad(wh, ((0, 0), (0, GP - 4 * H))).astype(jnp.bfloat16)         # (H, GP)
    bp = jnp.pad(b, ((0, 0), (0, GP - 4 * H))).astype(jnp.float32)            # (1, GP)

    # t-major flatten (a 4 KiB transpose, negligible) so each step reads one
    # dense (B, GP) sublane tile of the hoisted projection.
    x2 = jnp.transpose(x, (1, 0, 2)).reshape(T * B, F).astype(jnp.float32)

    out_padded = pl.pallas_call(
        lstm_kernel,
        out_shape=jax.ShapeDtypeStruct((T, B, HP), jnp.float32),
        in_specs=[
            pl.BlockSpec(memory_space=pltpu.MemorySpace.VMEM),   # x2
            pl.BlockSpec(memory_space=pltpu.MemorySpace.VMEM),   # Wx (packed)
            pl.BlockSpec(memory_space=pltpu.MemorySpace.VMEM),   # Wh (packed, bf16)
            pl.BlockSpec(memory_space=pltpu.MemorySpace.VMEM),   # bias (packed)
        ],
        out_specs=pl.BlockSpec(memory_space=pltpu.MemorySpace.VMEM),
        # Everything fits trivially in VMEM at these shapes.  For large H: raise
        # vmem_limit_bytes via pltpu.CompilerParams and add a leading "parallel"
        # batch grid axis (v7x: 2 TensorCores, 64 MiB VMEM).
    )(x2, wxp, whp, bp)

    # One cheap epilogue slice/transpose instead of per-step masked narrow stores.
    return out_padded[:, :, :H].transpose(1, 0, 2).astype(x.dtype)


def lstm_reference(x, wx, wh, b):
    """Pure-JAX fp32 reference mirroring the PyTorch forward exactly."""
    B, T, F = x.shape
    H = wx.shape[1] // 4

    def step(carry, x_t):
        h, c = carry
        gates = x_t @ wx + h @ wh + b[0]
        i = jax.nn.sigmoid(gates[:, 0 * H:1 * H])
        f = jax.nn.sigmoid(gates[:, 1 * H:2 * H])
        g = jnp.tanh(gates[:, 2 * H:3 * H])
        o = jax.nn.sigmoid(gates[:, 3 * H:4 * H])
        c_new = c * f + i * g
        h_new = o * jnp.tanh(c_new)
        return (h_new, c_new), h_new

    h0 = jnp.zeros((B, H), jnp.float32)
    c0 = jnp.zeros((B, H), jnp.float32)
    (_, _), hs = jax.lax.scan(step, (h0, c0), jnp.transpose(x, (1, 0, 2)))
    return jnp.transpose(hs, (1, 0, 2))


if __name__ == "__main__":
    # Small shapes consistent with the module: batch=8, seq=8, input_dim=16, hidden=32.
    B, T, F, H = 8, 8, 16, 32

    key = jax.random.PRNGKey(0)
    keys = jax.random.split(key, 9)
    kx, kws = keys[0], keys[1:]

    x = jax.random.normal(kx, (B, T, F), dtype=jnp.float32)

    # Mirror the PyTorch module: four nn.Linear(F + H, H) layers
    # (input_gate, forget_gate, cell_state, output_gate) acting on concat(x, h),
    # packed on the 4H axis as [input | forget | cell | output] and split into
    # the x-half (wx) and h-half (wh) of each weight.
    scale = 1.0 / jnp.sqrt(jnp.float32(F + H))
    gate_w = [jax.random.normal(kws[g], (F + H, H), jnp.float32) * scale
              for g in range(4)]
    gate_b = [jax.random.normal(kws[4 + g], (1, H), jnp.float32) * scale
              for g in range(4)]
    w_full = jnp.concatenate(gate_w, axis=1)       # (F+H, 4H)
    wx = w_full[:F, :]                             # (F, 4H)
    wh = w_full[F:, :]                             # (H, 4H)
    b = jnp.concatenate(gate_b, axis=1)            # (1, 4H)

    out = jax.block_until_ready(lstm_forward(x, wx, wh, b))
    ref = jax.block_until_ready(lstm_reference(x, wx, wh, b))

    assert out.shape == (B, T, H), out.shape
    # bf16 operands on the recurrence matmul (per perf review) -> loosened tolerance.
    err = float(jnp.max(jnp.abs(out - ref)))
    assert err < 3e-2, err

    print("KERNEL_OK")
</pallas_src>

<mosaic_0001>
module attributes {stable_mosaic.version = 11 : i64} {
  func.func @lstm_kernel(%arg0: memref<64x16xf32, #tpu.memory_space<vmem>>, %arg1: memref<16x128xf32, #tpu.memory_space<vmem>>, %arg2: memref<32x128xbf16, #tpu.memory_space<vmem>>, %arg3: memref<1x128xf32, #tpu.memory_space<vmem>>, %arg4: memref<8x8x128xf32, #tpu.memory_space<vmem>>) attributes {dimension_semantics = [], scalar_prefetch = 0 : i64, scratch_operands = 0 : i64, tpu.core_type = #tpu.core_type<tc>} {
    %c0 = arith.constant 0 : index
    %c0_0 = arith.constant 0 : index
    %0 = vector.load %arg0[%c0, %c0_0] : memref<64x16xf32, #tpu.memory_space<vmem>>, vector<64x16xf32>
    %c0_1 = arith.constant 0 : index
    %c0_2 = arith.constant 0 : index
    %1 = vector.load %arg1[%c0_1, %c0_2] : memref<16x128xf32, #tpu.memory_space<vmem>>, vector<16x128xf32>
    %cst = arith.constant dense<0.000000e+00> : vector<64x128xf32>
    %2 = tpu.matmul %0, %1, %cst {dimension_numbers = #tpu.dot_dimension_numbers<[1], [0], [0], [1], [0, 0, 1, 1], [], []>} : vector<64x16xf32>, vector<16x128xf32>, vector<64x128xf32> -> vector<64x128xf32>
    %c0_3 = arith.constant 0 : index
    %c0_4 = arith.constant 0 : index
    %3 = vector.load %arg3[%c0_3, %c0_4] : memref<1x128xf32, #tpu.memory_space<vmem>>, vector<1x128xf32>
    %4 = vector.broadcast %3 : vector<1x128xf32> to vector<64x128xf32>
    %5 = arith.addf %2, %4 : vector<64x128xf32>
    %c0_5 = arith.constant 0 : index
    %c0_6 = arith.constant 0 : index
    %6 = vector.load %arg2[%c0_5, %c0_6] : memref<32x128xbf16, #tpu.memory_space<vmem>>, vector<32x128xbf16>
    %cst_7 = arith.constant 0.000000e+00 : bf16
    %7 = vector.broadcast %cst_7 : bf16 to vector<8x32xbf16>
    %cst_8 = arith.constant 0.000000e+00 : f32
    %8 = vector.broadcast %cst_8 : f32 to vector<8x32xf32>
    %cst_9 = arith.constant 0.000000e+00 : f32
    %9 = vector.broadcast %cst_9 : f32 to vector<8x96xf32>
    %10 = vector.extract_strided_slice %5 {offsets = [0, 0], sizes = [8, 128], strides = [1, 1]} : vector<64x128xf32> to vector<8x128xf32>
    %cst_10 = arith.constant dense<0.000000e+00> : vector<8x128xf32>
    %11 = tpu.matmul %7, %6, %cst_10 {dimension_numbers = #tpu.dot_dimension_numbers<[1], [0], [0], [1], [0, 0, 1, 1], [], []>} : vector<8x32xbf16>, vector<32x128xbf16>, vector<8x128xf32> -> vector<8x128xf32>
    %12 = arith.addf %10, %11 : vector<8x128xf32>
    %cst_11 = arith.constant 5.000000e-01 : f32
    %13 = vector.broadcast %cst_11 : f32 to vector<8x128xf32>
    %14 = arith.mulf %13, %12 : vector<8x128xf32>
    %15 = math.tanh %14 : vector<8x128xf32>
    %cst_12 = arith.constant 1.000000e+00 : f32
    %16 = vector.broadcast %cst_12 : f32 to vector<8x128xf32>
    %17 = arith.addf %16, %15 : vector<8x128xf32>
    %cst_13 = arith.constant 5.000000e-01 : f32
    %18 = vector.broadcast %cst_13 : f32 to vector<8x128xf32>
    %19 = arith.mulf %18, %17 : vector<8x128xf32>
    %20 = vector.extract_strided_slice %19 {offsets = [0, 0], sizes = [8, 32], strides = [1, 1]} : vector<8x128xf32> to vector<8x32xf32>
    %21 = vector.extract_strided_slice %19 {offsets = [0, 32], sizes = [8, 32], strides = [1, 1]} : vector<8x128xf32> to vector<8x32xf32>
    %22 = vector.extract_strided_slice %19 {offsets = [0, 96], sizes = [8, 32], strides = [1, 1]} : vector<8x128xf32> to vector<8x32xf32>
    %23 = vector.extract_strided_slice %12 {offsets = [0, 64], sizes = [8, 32], strides = [1, 1]} : vector<8x128xf32> to vector<8x32xf32>
    %24 = math.tanh %23 : vector<8x32xf32>
    %25 = arith.mulf %8, %21 : vector<8x32xf32>
    %26 = arith.mulf %20, %24 : vector<8x32xf32>
    %27 = arith.addf %25, %26 : vector<8x32xf32>
    %28 = math.tanh %27 : vector<8x32xf32>
    %29 = arith.mulf %22, %28 : vector<8x32xf32>
    %30 = arith.truncf %29 : vector<8x32xf32> to vector<8x32xbf16>
    %31 = tpu.concatenate %29, %9 in 1 : vector<8x32xf32>, vector<8x96xf32> -> vector<8x128xf32>
    %c0_14 = arith.constant 0 : index
    %c0_15 = arith.constant 0 : index
    %c0_16 = arith.constant 0 : index
    %32 = vector.load %arg4[%c0_14, %c0_15, %c0_16] : memref<8x8x128xf32, #tpu.memory_space<vmem>>, vector<1x8x128xf32>
    %33 = vector.shape_cast %32 : vector<1x8x128xf32> to vector<8x128xf32>
    %34 = vector.shape_cast %31 : vector<8x128xf32> to vector<1x8x128xf32>
    tpu.vector_store %arg4[%c0_14, %c0_15, %c0_16], %34 {strides = array<i32>} : memref<8x8x128xf32, #tpu.memory_space<vmem>>, vector<1x8x128xf32>,
    %35 = vector.extract_strided_slice %5 {offsets = [8, 0], sizes = [8, 128], strides = [1, 1]} : vector<64x128xf32> to vector<8x128xf32>
    %cst_17 = arith.constant dense<0.000000e+00> : vector<8x128xf32>
    %36 = tpu.matmul %30, %6, %cst_17 {dimension_numbers = #tpu.dot_dimension_numbers<[1], [0], [0], [1], [0, 0, 1, 1], [], []>} : vector<8x32xbf16>, vector<32x128xbf16>, vector<8x128xf32> -> vector<8x128xf32>
    %37 = arith.addf %35, %36 : vector<8x128xf32>
    %cst_18 = arith.constant 5.000000e-01 : f32
    %38 = vector.broadcast %cst_18 : f32 to vector<8x128xf32>
    %39 = arith.mulf %38, %37 : vector<8x128xf32>
    %40 = math.tanh %39 : vector<8x128xf32>
    %cst_19 = arith.constant 1.000000e+00 : f32
    %41 = vector.broadcast %cst_19 : f32 to vector<8x128xf32>
    %42 = arith.addf %41, %40 : vector<8x128xf32>
    %cst_20 = arith.constant 5.000000e-01 : f32
    %43 = vector.broadcast %cst_20 : f32 to vector<8x128xf32>
    %44 = arith.mulf %43, %42 : vector<8x128xf32>
    %45 = vector.extract_strided_slice %44 {offsets = [0, 0], sizes = [8, 32], strides = [1, 1]} : vector<8x128xf32> to vector<8x32xf32>
    %46 = vector.extract_strided_slice %44 {offsets = [0, 32], sizes = [8, 32], strides = [1, 1]} : vector<8x128xf32> to vector<8x32xf32>
    %47 = vector.extract_strided_slice %44 {offsets = [0, 96], sizes = [8, 32], strides = [1, 1]} : vector<8x128xf32> to vector<8x32xf32>
    %48 = vector.extract_strided_slice %37 {offsets = [0, 64], sizes = [8, 32], strides = [1, 1]} : vector<8x128xf32> to vector<8x32xf32>
    %49 = math.tanh %48 : vector<8x32xf32>
    %50 = arith.mulf %27, %46 : vector<8x32xf32>
    %51 = arith.mulf %45, %49 : vector<8x32xf32>
    %52 = arith.addf %50, %51 : vector<8x32xf32>
    %53 = math.tanh %52 : vector<8x32xf32>
    %54 = arith.mulf %47, %53 : vector<8x32xf32>
    %55 = arith.truncf %54 : vector<8x32xf32> to vector<8x32xbf16>
    %56 = tpu.concatenate %54, %9 in 1 : vector<8x32xf32>, vector<8x96xf32> -> vector<8x128xf32>
    %c1 = arith.constant 1 : index
    %c0_21 = arith.constant 0 : index
    %c0_22 = arith.constant 0 : index
    %57 = vector.load %arg4[%c1, %c0_21, %c0_22] : memref<8x8x128xf32, #tpu.memory_space<vmem>>, vector<1x8x128xf32>
    %58 = vector.shape_cast %57 : vector<1x8x128xf32> to vector<8x128xf32>
    %59 = vector.shape_cast %56 : vector<8x128xf32> to vector<1x8x128xf32>
    tpu.vector_store %arg4[%c1, %c0_21, %c0_22], %59 {strides = array<i32>} : memref<8x8x128xf32, #tpu.memory_space<vmem>>, vector<1x8x128xf32>,
    %60 = vector.extract_strided_slice %5 {offsets = [16, 0], sizes = [8, 128], strides = [1, 1]} : vector<64x128xf32> to vector<8x128xf32>
    %cst_23 = arith.constant dense<0.000000e+00> : vector<8x128xf32>
    %61 = tpu.matmul %55, %6, %cst_23 {dimension_numbers = #tpu.dot_dimension_numbers<[1], [0], [0], [1], [0, 0, 1, 1], [], []>} : vector<8x32xbf16>, vector<32x128xbf16>, vector<8x128xf32> -> vector<8x128xf32>
    %62 = arith.addf %60, %61 : vector<8x128xf32>
    %cst_24 = arith.constant 5.000000e-01 : f32
    %63 = vector.broadcast %cst_24 : f32 to vector<8x128xf32>
    %64 = arith.mulf %63, %62 : vector<8x128xf32>
    %65 = math.tanh %64 : vector<8x128xf32>
    %cst_25 = arith.constant 1.000000e+00 : f32
    %66 = vector.broadcast %cst_25 : f32 to vector<8x128xf32>
    %67 = arith.addf %66, %65 : vector<8x128xf32>
    %cst_26 = arith.constant 5.000000e-01 : f32
    %68 = vector.broadcast %cst_26 : f32 to vector<8x128xf32>
    %69 = arith.mulf %68, %67 : vector<8x128xf32>
    %70 = vector.extract_strided_slice %69 {offsets = [0, 0], sizes = [8, 32], strides = [1, 1]} : vector<8x128xf32> to vector<8x32xf32>
    %71 = vector.extract_strided_slice %69 {offsets = [0, 32], sizes = [8, 32], strides = [1, 1]} : vector<8x128xf32> to vector<8x32xf32>
    %72 = vector.extract_strided_slice %69 {offsets = [0, 96], sizes = [8, 32], strides = [1, 1]} : vector<8x128xf32> to vector<8x32xf32>
    %73 = vector.extract_strided_slice %62 {offsets = [0, 64], sizes = [8, 32], strides = [1, 1]} : vector<8x128xf32> to vector<8x32xf32>
    %74 = math.tanh %73 : vector<8x32xf32>
    %75 = arith.mulf %52, %71 : vector<8x32xf32>
    %76 = arith.mulf %70, %74 : vector<8x32xf32>
    %77 = arith.addf %75, %76 : vector<8x32xf32>
    %78 = math.tanh %77 : vector<8x32xf32>
    %79 = arith.mulf %72, %78 : vector<8x32xf32>
    %80 = arith.truncf %79 : vector<8x32xf32> to vector<8x32xbf16>
    %81 = tpu.concatenate %79, %9 in 1 : vector<8x32xf32>, vector<8x96xf32> -> vector<8x128xf32>
    %c2 = arith.constant 2 : index
    %c0_27 = arith.constant 0 : index
    %c0_28 = arith.constant 0 : index
    %82 = vector.load %arg4[%c2, %c0_27, %c0_28] : memref<8x8x128xf32, #tpu.memory_space<vmem>>, vector<1x8x128xf32>
    %83 = vector.shape_cast %82 : vector<1x8x128xf32> to vector<8x128xf32>
    %84 = vector.shape_cast %81 : vector<8x128xf32> to vector<1x8x128xf32>
    tpu.vector_store %arg4[%c2, %c0_27, %c0_28], %84 {strides = array<i32>} : memref<8x8x128xf32, #tpu.memory_space<vmem>>, vector<1x8x128xf32>,
    %85 = vector.extract_strided_slice %5 {offsets = [24, 0], sizes = [8, 128], strides = [1, 1]} : vector<64x128xf32> to vector<8x128xf32>
    %cst_29 = arith.constant dense<0.000000e+00> : vector<8x128xf32>
    %86 = tpu.matmul %80, %6, %cst_29 {dimension_numbers = #tpu.dot_dimension_numbers<[1], [0], [0], [1], [0, 0, 1, 1], [], []>} : vector<8x32xbf16>, vector<32x128xbf16>, vector<8x128xf32> -> vector<8x128xf32>
    %87 = arith.addf %85, %86 : vector<8x128xf32>
    %cst_30 = arith.constant 5.000000e-01 : f32
    %88 = vector.broadcast %cst_30 : f32 to vector<8x128xf32>
    %89 = arith.mulf %88, %87 : vector<8x128xf32>
    %90 = math.tanh %89 : vector<8x128xf32>
    %cst_31 = arith.constant 1.000000e+00 : f32
    %91 = vector.broadcast %cst_31 : f32 to vector<8x128xf32>
    %92 = arith.addf %91, %90 : vector<8x128xf32>
    %cst_32 = arith.constant 5.000000e-01 : f32
    %93 = vector.broadcast %cst_32 : f32 to vector<8x128xf32>
    %94 = arith.mulf %93, %92 : vector<8x128xf32>
    %95 = vector.extract_strided_slice %94 {offsets = [0, 0], sizes = [8, 32], strides = [1, 1]} : vector<8x128xf32> to vector<8x32xf32>
    %96 = vector.extract_strided_slice %94 {offsets = [0, 32], sizes = [8, 32], strides = [1, 1]} : vector<8x128xf32> to vector<8x32xf32>
    %97 = vector.extract_strided_slice %94 {offsets = [0, 96], sizes = [8, 32], strides = [1, 1]} : vector<8x128xf32> to vector<8x32xf32>
    %98 = vector.extract_strided_slice %87 {offsets = [0, 64], sizes = [8, 32], strides = [1, 1]} : vector<8x128xf32> to vector<8x32xf32>
    %99 = math.tanh %98 : vector<8x32xf32>
    %100 = arith.mulf %77, %96 : vector<8x32xf32>
    %101 = arith.mulf %95, %99 : vector<8x32xf32>
    %102 = arith.addf %100, %101 : vector<8x32xf32>
    %103 = math.tanh %102 : vector<8x32xf32>
    %104 = arith.mulf %97, %103 : vector<8x32xf32>
    %105 = arith.truncf %104 : vector<8x32xf32> to vector<8x32xbf16>
    %106 = tpu.concatenate %104, %9 in 1 : vector<8x32xf32>, vector<8x96xf32> -> vector<8x128xf32>
    %c3 = arith.constant 3 : index
    %c0_33 = arith.constant 0 : index
    %c0_34 = arith.constant 0 : index
    %107 = vector.load %arg4[%c3, %c0_33, %c0_34] : memref<8x8x128xf32, #tpu.memory_space<vmem>>, vector<1x8x128xf32>
    %108 = vector.shape_cast %107 : vector<1x8x128xf32> to vector<8x128xf32>
    %109 = vector.shape_cast %106 : vector<8x128xf32> to vector<1x8x128xf32>
    tpu.vector_store %arg4[%c3, %c0_33, %c0_34], %109 {strides = array<i32>} : memref<8x8x128xf32, #tpu.memory_space<vmem>>, vector<1x8x128xf32>,
    %110 = vector.extract_strided_slice %5 {offsets = [32, 0], sizes = [8, 128], strides = [1, 1]} : vector<64x128xf32> to vector<8x128xf32>
    %cst_35 = arith.constant dense<0.000000e+00> : vector<8x128xf32>
    %111 = tpu.matmul %105, %6, %cst_35 {dimension_numbers = #tpu.dot_dimension_numbers<[1], [0], [0], [1], [0, 0, 1, 1], [], []>} : vector<8x32xbf16>, vector<32x128xbf16>, vector<8x128xf32> -> vector<8x128xf32>
    %112 = arith.addf %110, %111 : vector<8x128xf32>
    %cst_36 = arith.constant 5.000000e-01 : f32
    %113 = vector.broadcast %cst_36 : f32 to vector<8x128xf32>
    %114 = arith.mulf %113, %112 : vector<8x128xf32>
    %115 = math.tanh %114 : vector<8x128xf32>
    %cst_37 = arith.constant 1.000000e+00 : f32
    %116 = vector.broadcast %cst_37 : f32 to vector<8x128xf32>
    %117 = arith.addf %116, %115 : vector<8x128xf32>
    %cst_38 = arith.constant 5.000000e-01 : f32
    %118 = vector.broadcast %cst_38 : f32 to vector<8x128xf32>
    %119 = arith.mulf %118, %117 : vector<8x128xf32>
    %120 = vector.extract_strided_slice %119 {offsets = [0, 0], sizes = [8, 32], strides = [1, 1]} : vector<8x128xf32> to vector<8x32xf32>
    %121 = vector.extract_strided_slice %119 {offsets = [0, 32], sizes = [8, 32], strides = [1, 1]} : vector<8x128xf32> to vector<8x32xf32>
    %122 = vector.extract_strided_slice %119 {offsets = [0, 96], sizes = [8, 32], strides = [1, 1]} : vector<8x128xf32> to vector<8x32xf32>
    %123 = vector.extract_strided_slice %112 {offsets = [0, 64], sizes = [8, 32], strides = [1, 1]} : vector<8x128xf32> to vector<8x32xf32>
    %124 = math.tanh %123 : vector<8x32xf32>
    %125 = arith.mulf %102, %121 : vector<8x32xf32>
    %126 = arith.mulf %120, %124 : vector<8x32xf32>
    %127 = arith.addf %125, %126 : vector<8x32xf32>
    %128 = math.tanh %127 : vector<8x32xf32>
    %129 = arith.mulf %122, %128 : vector<8x32xf32>
    %130 = arith.truncf %129 : vector<8x32xf32> to vector<8x32xbf16>
    %131 = tpu.concatenate %129, %9 in 1 : vector<8x32xf32>, vector<8x96xf32> -> vector<8x128xf32>
    %c4 = arith.constant 4 : index
    %c0_39 = arith.constant 0 : index
    %c0_40 = arith.constant 0 : index
    %132 = vector.load %arg4[%c4, %c0_39, %c0_40] : memref<8x8x128xf32, #tpu.memory_space<vmem>>, vector<1x8x128xf32>
    %133 = vector.shape_cast %132 : vector<1x8x128xf32> to vector<8x128xf32>
    %134 = vector.shape_cast %131 : vector<8x128xf32> to vector<1x8x128xf32>
    tpu.vector_store %arg4[%c4, %c0_39, %c0_40], %134 {strides = array<i32>} : memref<8x8x128xf32, #tpu.memory_space<vmem>>, vector<1x8x128xf32>,
    %135 = vector.extract_strided_slice %5 {offsets = [40, 0], sizes = [8, 128], strides = [1, 1]} : vector<64x128xf32> to vector<8x128xf32>
    %cst_41 = arith.constant dense<0.000000e+00> : vector<8x128xf32>
    %136 = tpu.matmul %130, %6, %cst_41 {dimension_numbers = #tpu.dot_dimension_numbers<[1], [0], [0], [1], [0, 0, 1, 1], [], []>} : vector<8x32xbf16>, vector<32x128xbf16>, vector<8x128xf32> -> vector<8x128xf32>
    %137 = arith.addf %135, %136 : vector<8x128xf32>
    %cst_42 = arith.constant 5.000000e-01 : f32
    %138 = vector.broadcast %cst_42 : f32 to vector<8x128xf32>
    %139 = arith.mulf %138, %137 : vector<8x128xf32>
    %140 = math.tanh %139 : vector<8x128xf32>
    %cst_43 = arith.constant 1.000000e+00 : f32
    %141 = vector.broadcast %cst_43 : f32 to vector<8x128xf32>
    %142 = arith.addf %141, %140 : vector<8x128xf32>
    %cst_44 = arith.constant 5.000000e-01 : f32
    %143 = vector.broadcast %cst_44 : f32 to vector<8x128xf32>
    %144 = arith.mulf %143, %142 : vector<8x128xf32>
    %145 = vector.extract_strided_slice %144 {offsets = [0, 0], sizes = [8, 32], strides = [1, 1]} : vector<8x128xf32> to vector<8x32xf32>
    %146 = vector.extract_strided_slice %144 {offsets = [0, 32], sizes = [8, 32], strides = [1, 1]} : vector<8x128xf32> to vector<8x32xf32>
    %147 = vector.extract_strided_slice %144 {offsets = [0, 96], sizes = [8, 32], strides = [1, 1]} : vector<8x128xf32> to vector<8x32xf32>
    %148 = vector.extract_strided_slice %137 {offsets = [0, 64], sizes = [8, 32], strides = [1, 1]} : vector<8x128xf32> to vector<8x32xf32>
    %149 = math.tanh %148 : vector<8x32xf32>
    %150 = arith.mulf %127, %146 : vector<8x32xf32>
    %151 = arith.mulf %145, %149 : vector<8x32xf32>
    %152 = arith.addf %150, %151 : vector<8x32xf32>
    %153 = math.tanh %152 : vector<8x32xf32>
    %154 = arith.mulf %147, %153 : vector<8x32xf32>
    %155 = arith.truncf %154 : vector<8x32xf32> to vector<8x32xbf16>
    %156 = tpu.concatenate %154, %9 in 1 : vector<8x32xf32>, vector<8x96xf32> -> vector<8x128xf32>
    %c5 = arith.constant 5 : index
    %c0_45 = arith.constant 0 : index
    %c0_46 = arith.constant 0 : index
    %157 = vector.load %arg4[%c5, %c0_45, %c0_46] : memref<8x8x128xf32, #tpu.memory_space<vmem>>, vector<1x8x128xf32>
    %158 = vector.shape_cast %157 : vector<1x8x128xf32> to vector<8x128xf32>
    %159 = vector.shape_cast %156 : vector<8x128xf32> to vector<1x8x128xf32>
    tpu.vector_store %arg4[%c5, %c0_45, %c0_46], %159 {strides = array<i32>} : memref<8x8x128xf32, #tpu.memory_space<vmem>>, vector<1x8x128xf32>,
    %160 = vector.extract_strided_slice %5 {offsets = [48, 0], sizes = [8, 128], strides = [1, 1]} : vector<64x128xf32> to vector<8x128xf32>
    %cst_47 = arith.constant dense<0.000000e+00> : vector<8x128xf32>
    %161 = tpu.matmul %155, %6, %cst_47 {dimension_numbers = #tpu.dot_dimension_numbers<[1], [0], [0], [1], [0, 0, 1, 1], [], []>} : vector<8x32xbf16>, vector<32x128xbf16>, vector<8x128xf32> -> vector<8x128xf32>
    %162 = arith.addf %160, %161 : vector<8x128xf32>
    %cst_48 = arith.constant 5.000000e-01 : f32
    %163 = vector.broadcast %cst_48 : f32 to vector<8x128xf32>
    %164 = arith.mulf %163, %162 : vector<8x128xf32>
    %165 = math.tanh %164 : vector<8x128xf32>
    %cst_49 = arith.constant 1.000000e+00 : f32
    %166 = vector.broadcast %cst_49 : f32 to vector<8x128xf32>
    %167 = arith.addf %166, %165 : vector<8x128xf32>
    %cst_50 = arith.constant 5.000000e-01 : f32
    %168 = vector.broadcast %cst_50 : f32 to vector<8x128xf32>
    %169 = arith.mulf %168, %167 : vector<8x128xf32>
    %170 = vector.extract_strided_slice %169 {offsets = [0, 0], sizes = [8, 32], strides = [1, 1]} : vector<8x128xf32> to vector<8x32xf32>
    %171 = vector.extract_strided_slice %169 {offsets = [0, 32], sizes = [8, 32], strides = [1, 1]} : vector<8x128xf32> to vector<8x32xf32>
    %172 = vector.extract_strided_slice %169 {offsets = [0, 96], sizes = [8, 32], strides = [1, 1]} : vector<8x128xf32> to vector<8x32xf32>
    %173 = vector.extract_strided_slice %162 {offsets = [0, 64], sizes = [8, 32], strides = [1, 1]} : vector<8x128xf32> to vector<8x32xf32>
    %174 = math.tanh %173 : vector<8x32xf32>
    %175 = arith.mulf %152, %171 : vector<8x32xf32>
    %176 = arith.mulf %170, %174 : vector<8x32xf32>
    %177 = arith.addf %175, %176 : vector<8x32xf32>
    %178 = math.tanh %177 : vector<8x32xf32>
    %179 = arith.mulf %172, %178 : vector<8x32xf32>
    %180 = arith.truncf %179 : vector<8x32xf32> to vector<8x32xbf16>
    %181 = tpu.concatenate %179, %9 in 1 : vector<8x32xf32>, vector<8x96xf32> -> vector<8x128xf32>
    %c6 = arith.constant 6 : index
    %c0_51 = arith.constant 0 : index
    %c0_52 = arith.constant 0 : index
    %182 = vector.load %arg4[%c6, %c0_51, %c0_52] : memref<8x8x128xf32, #tpu.memory_space<vmem>>, vector<1x8x128xf32>
    %183 = vector.shape_cast %182 : vector<1x8x128xf32> to vector<8x128xf32>
    %184 = vector.shape_cast %181 : vector<8x128xf32> to vector<1x8x128xf32>
    tpu.vector_store %arg4[%c6, %c0_51, %c0_52], %184 {strides = array<i32>} : memref<8x8x128xf32, #tpu.memory_space<vmem>>, vector<1x8x128xf32>,
    %185 = vector.extract_strided_slice %5 {offsets = [56, 0], sizes = [8, 128], strides = [1, 1]} : vector<64x128xf32> to vector<8x128xf32>
    %cst_53 = arith.constant dense<0.000000e+00> : vector<8x128xf32>
    %186 = tpu.matmul %180, %6, %cst_53 {dimension_numbers = #tpu.dot_dimension_numbers<[1], [0], [0], [1], [0, 0, 1, 1], [], []>} : vector<8x32xbf16>, vector<32x128xbf16>, vector<8x128xf32> -> vector<8x128xf32>
    %187 = arith.addf %185, %186 : vector<8x128xf32>
    %cst_54 = arith.constant 5.000000e-01 : f32
    %188 = vector.broadcast %cst_54 : f32 to vector<8x128xf32>
    %189 = arith.mulf %188, %187 : vector<8x128xf32>
    %190 = math.tanh %189 : vector<8x128xf32>
    %cst_55 = arith.constant 1.000000e+00 : f32
    %191 = vector.broadcast %cst_55 : f32 to vector<8x128xf32>
    %192 = arith.addf %191, %190 : vector<8x128xf32>
    %cst_56 = arith.constant 5.000000e-01 : f32
    %193 = vector.broadcast %cst_56 : f32 to vector<8x128xf32>
    %194 = arith.mulf %193, %192 : vector<8x128xf32>
    %195 = vector.extract_strided_slice %194 {offsets = [0, 0], sizes = [8, 32], strides = [1, 1]} : vector<8x128xf32> to vector<8x32xf32>
    %196 = vector.extract_strided_slice %194 {offsets = [0, 32], sizes = [8, 32], strides = [1, 1]} : vector<8x128xf32> to vector<8x32xf32>
    %197 = vector.extract_strided_slice %194 {offsets = [0, 96], sizes = [8, 32], strides = [1, 1]} : vector<8x128xf32> to vector<8x32xf32>
    %198 = vector.extract_strided_slice %187 {offsets = [0, 64], sizes = [8, 32], strides = [1, 1]} : vector<8x128xf32> to vector<8x32xf32>
    %199 = math.tanh %198 : vector<8x32xf32>
    %200 = arith.mulf %177, %196 : vector<8x32xf32>
    %201 = arith.mulf %195, %199 : vector<8x32xf32>
    %202 = arith.addf %200, %201 : vector<8x32xf32>
    %203 = math.tanh %202 : vector<8x32xf32>
    %204 = arith.mulf %197, %203 : vector<8x32xf32>
    %205 = tpu.concatenate %204, %9 in 1 : vector<8x32xf32>, vector<8x96xf32> -> vector<8x128xf32>
    %c7 = arith.constant 7 : index
    %c0_57 = arith.constant 0 : index
    %c0_58 = arith.constant 0 : index
    %206 = vector.load %arg4[%c7, %c0_57, %c0_58] : memref<8x8x128xf32, #tpu.memory_space<vmem>>, vector<1x8x128xf32>
    %207 = vector.shape_cast %206 : vector<1x8x128xf32> to vector<8x128xf32>
    %208 = vector.shape_cast %205 : vector<8x128xf32> to vector<1x8x128xf32>
    tpu.vector_store %arg4[%c7, %c0_57, %c0_58], %208 {strides = array<i32>} : memref<8x8x128xf32, #tpu.memory_space<vmem>>, vector<1x8x128xf32>,
    return
  }
}

</mosaic_0001>

<bundles_post_ra>
// kernel: tpu_custom_call.1
= control target key start
LH: loop header
LB: loop body
LE: loop exit
PB: predicated region body
PF: predicated region fallthrough
CT: control target
= control target key end

     0   :  { %vm36_vm0 = vcmask 130048   ;;  %v1028_v2 = vmov 0.0   ;;  %vm1029_vm1 = vmmov 0   ;;  %s1278_s0 = inlined_call_operand.vmem [shape: f32[64,16], index: 0, kind: input, shape index: {}]   ;;  %s1279_s1 = inlined_call_operand.vmem [shape: f32[16,128], index: 1, kind: input, shape index: {}]   ;;  %s1280_s2 = inlined_call_operand.vmem [shape: bf16[32,128], index: 2, kind: input, shape index: {}]   ;;  %s1281_s3 = inlined_call_operand.vmem [shape: f32[1,128], index: 3, kind: input, shape index: {}]   ;;  %s1282_s4 = inlined_call_operand.hbm [shape: f32[8,8,128], index: 4, kind: output, shape index: {}]  }
   0x1   :  { %v27_v0 = vld [vmem:[%s1279_s1] sm:$0xff]  ;;  %v28_v1 = vld [vmem:[%s1279_s1 + $0x8] sm:$0xff]  ;;  %878 = vmatprep.subr.bf16.mxu1 %v1028_v2  ;;  %882 = vmatprep.mubr.msk.bf16.mxu1 %vm1029_vm1, %v1028_v2 }
   0x2   :  { %v942_v3 = vpack.c.bf16 %v28_v1, %v27_v0  ;;  %v1071_v4 = vld [vmem:[%s1280_s2] sm:$0xff]   ;;  %v1083_v6 = vld [vmem:[%s1280_s2 + $0x8] sm:$0xff]  }
   0x3   :  { %v19_v5 = vld [vmem:[%s1278_s0] sm:$0xff]  ;;  %879 = vmatpush3.bf16.msra.mxu1 %v1071_v4 }
   0x4   :  { %866 = vmatprep.mubr.msk.f32.mxu0 %vm36_vm0, %v19_v5  ;;  %943 = vmatprep.subr.bf16.mxu0 %v942_v3 }
   0x5   :  { %9 = vsyncpa [#allocation3], 0  ;;  %945 = vmatpush3.bf16.msra.mxu0 %v942_v3  ;;  %880 = vmatprep.subr.bf16.mxu1 %v1028_v2  ;;  %v20_v7 = vld [vmem:[%s1278_s0 + $0x8] sm:$0xff]  ;;  %v1030_v8 = vmov 0   ;;  %v1106_v9 = vld [vmem:[%s1281_s3] ss:$0 sm:$0xff] }
   0x6   :  { %894 = vmatprep.subr.bf16.mxu0 %v1028_v2  ;;  %s1031_s27 = smov 64   ;;  %s1032_s3 = smov 32   ;;  %vm182_vm2 = vcmask 261120   ;;  %v21_v49 = vld [vmem:[%s1278_s0 + $0x10] sm:$0xff]  ;;  %v22_v50 = vld [vmem:[%s1278_s0 + $0x18] sm:$0xff]  ;;  %v23_v51 = vld [vmem:[%s1278_s0 + $0x20] sm:$0xff] }
   0x7   :  { %881 = vmatpush3.bf16.msra.mxu1 %v1083_v6  ;;  %v24_v52 = vld [vmem:[%s1278_s0 + $0x28] sm:$0xff]  ;;  %v25_v53 = vld [vmem:[%s1278_s0 + $0x30] sm:$0xff]  ;;  %v26_v54 = vld [vmem:[%s1278_s0 + $0x38] sm:$0xff]  ;;  %s1033_s0 = smov [#allocation2]  }
   0x8   :  { %867 = vmatmul.mubr.msk.f32.vlgmr.msra.gmra.mrb[0].mxu0 %vm36_vm0, %v20_v7  ;;  %886 = vmatprep.subr.bf16.mxu1 %v1028_v2  ;;  %s799_s14 = sshll.u32 %s1033_s0, 4  ;;  %s800_s14 = int_to_ptr.vmem [resolvable:$true] %s799_s14 }
   0x9   :  { %895 = vmatpush3.bf16.msra.mxu0 %v1071_v4  ;;  %869 = vmatprep.mubr.msk.f32.mxu0 %vm36_vm0, %v21_v49  ;;  %s1004_s15 = scalar_lea.vmem %s800_s14, 1024  ;;  %p1009_p1 = scmp.lt.s32.totalorder %s800_s14, %s800_s14 }
   0xa   :  { %896 = vmatprep.subr.bf16.mxu0 %v1028_v2  ;;  %883 = vmatmul.mubr.bf16.vlgmr.msra.gmra.mrb[0].mxu1 %v1030_v8  ;;  %p1005_p0 = scmp.ne.s32.totalorder %s800_s14, %s1004_s15  ;;  %p1010_p2 = scmp.lt.s32.totalorder %s1004_s15, %s1004_s15 }
   0xb   :  { %887 = vmatpush3.bf16.msra.mxu1 %v1071_v4  ;;  %890 = vmatprep.mubr.msk.bf16.mxu1 %vm1029_vm1, %v1028_v2 }
   0xc   :  { %888 = vmatprep.subr.bf16.mxu1 %v1028_v2  ;;  %870 = vmatmul.mubr.msk.f32.gmra.mrb[2].mxu0 %vm36_vm0, %v22_v50  ;;  %p1011_p3 = por %p1010_p2, %p1009_p1 }
   0xd   :  { %897 = vmatpush3.bf16.msra.mxu0 %v1083_v6  ;;  %872 = vmatprep.mubr.msk.f32.mxu0 %vm36_vm0, %v23_v51 }
   0xe   :  { %910 = vmatprep.subr.bf16.mxu0 %v1028_v2  ;;  %p1012_p4 = pnand %p1011_p3, %p1005_p0 }
   0xf   :  { %889 = vmatpush3.bf16.msra.mxu1 %v1083_v6 }
  0x10   :  { %902 = vmatprep.subr.bf16.mxu1 %v1028_v2  ;;  %873 = vmatmul.mubr.msk.f32.gmra.mrb[4].mxu0 %vm36_vm0, %v24_v52 }
  0x11   :  { %875 = vmatprep.mubr.msk.f32.mxu0 %vm36_vm0, %v25_v53 }
  0x14   :  { %876 = vmatmul.mubr.msk.f32.gmra.mrb[6].mxu0 %vm36_vm0, %v26_v54 }
  0x15   :  { %898 = vmatprep.mubr.msk.bf16.mxu0 %vm1029_vm1, %v1028_v2 }
  0xdb   :  { %v868_v10 = vpop.f32.mrb[0].mxu0 }
  0xdc   :  { %v127_v11 = vpop.f32.mrb[1].mxu0  ;;  %v133_v33 = vadd.f32 %v868_v10, %v1106_v9 }
  0xdd   :  { %v128_v12 = vadd.f32 %v1106_v9, %v127_v11  ;;  %v220_v13 = vpop.f32.mrb[0].mxu1 }
  0xde   :  { %v884_v15 = vpop.f32.mrb[1].mxu1 }
  0xdf   :  { %v226_v14 = vadd.f32 %v220_v13, %v128_v12  ;;  %v223_v16 = vpop.f32.mrb[2].mxu1  ;;  %v871_v59 = vpop.f32.mrb[2].mxu0 }
  0xe0   :  { %v885_v17 = vpop.f32.mrb[3].mxu1  ;;  %v137_v60 = vpop.f32.mrb[3].mxu0 }
  0xe1   :  { %956 = vtanh.f32 %v226_v14  ;;  %v227_v19 = vmul.f32 0.5, %v226_v14  ;;  %v138_v3 = vadd.f32 %v1106_v9, %v137_v60 }
  0xe3   :  { %958 = vtanh.f32 %v227_v19  ;;  %v1159_v61 = vpop.f32.mrb[4].mxu0 }
  0xe4   :  { %v1161_v62 = vpop.f32.mrb[5].mxu0 }
  0xe5   :  { %v148_v49 = vadd.f32 %v1106_v9, %v1161_v62 }
  0xe7   :  { %v1163_v63 = vpop.f32.mrb[6].mxu0 }
  0xe8   :  { %v1165_v0 = vpop.f32.mrb[7].mxu0 }
  0xeb   :  { %v957_v18 = vpop.eup %956 }
  0xec   :  { %234 = vrot.lane.b32.xlu0 %v957_v18, %s1031_s27 }
  0xed   :  { %v959_v20 = vpop.eup %958 }
  0xee   :  { %v229_v21 = vadd.f32 1.0, %v959_v20 }
  0xf0   :  { %v230_v22 = vmul.f32 0.5, %v229_v21 }
  0xf2   :  { %v232_v25 = vmul.f32 0.0, %v230_v22 }
 0x15e   :  { %v235_v23 = vpop.permute.xlu0 %234 }
 0x15f   :  { %v237_v24 = vmul.f32 %v235_v23, %v230_v22 }
 0x161   :  { %239 = vrot.lane.b32.xlu0 %v237_v24, %s1032_s3 }
 0x1d3   :  { %v240_v26 = vpop.permute.xlu0 %239 }
 0x1d4   :  { %v242_v27 = vadd.f32 %v240_v26, %v232_v25 }
 0x1d6   :  { %960 = vtanh.f32 %v242_v27 }
 0x1e0   :  { %v961_v28 = vpop.eup %960 }
 0x1e1   :  { %245 = vrot.lane.b32.xlu1 %v961_v28, %s1031_s27 }
 0x253   :  { %v246_v29 = vpop.permute.xlu1 %245 }
 0x254   :  { %v1112_v30 = vmul.f32 %v246_v29, %v230_v22 }
 0x256   :  { %v249_v31 = vpack.c.bf16 %v1112_v30, %v1112_v30 }
 0x258   :  { %257 = vrot.lane.b32.xlu1 %v249_v31, %s1032_s3 }
 0x2ca   :  { %v258_v32 = vpop.permute.xlu1 %257 }
 0x2cb   :  { %891 = vmatmul.mubr.msk.bf16.vlgmr.msra.gmra.mrb[4].mxu1 %vm182_vm2, %v258_v32 }
 0x2cc   :  { %903 = vmatpush3.bf16.msra.mxu1 %v1071_v4  ;;  %906 = vmatprep.mubr.msk.bf16.mxu1 %vm1029_vm1, %v1028_v2 }
 0x2cd   :  { %904 = vmatprep.subr.bf16.mxu1 %v1028_v2 }
 0x2d0   :  { %905 = vmatpush3.bf16.msra.mxu1 %v1083_v6 }
 0x2d1   :  { %918 = vmatprep.subr.bf16.mxu1 %v1028_v2 }
 0x39e   :  { %v296_v34 = vpop.f32.mrb[4].mxu1 }
 0x39f   :  { %v302_v35 = vadd.f32 %v296_v34, %v133_v33  ;;  %v892_v36 = vpop.f32.mrb[5].mxu1 }
 0x3a0   :  { %v299_v37 = vpop.f32.mrb[6].mxu1 }
 0x3a1   :  { %962 = vtanh.f32 %v302_v35  ;;  %v893_v38 = vpop.f32.mrb[7].mxu1  ;;  %v303_v40 = vmul.f32 0.5, %v302_v35 }
 0x3a3   :  { %964 = vtanh.f32 %v303_v40 }
 0x3ab   :  { %v963_v39 = vpop.eup %962 }
 0x3ac   :  { %310 = vrot.lane.b32.xlu0 %v963_v39, %s1031_s27 }
 0x3ad   :  { %v965_v41 = vpop.eup %964 }
 0x3ae   :  { %v305_v42 = vadd.f32 1.0, %v965_v41 }
 0x3b0   :  { %v306_v43 = vmul.f32 0.5, %v305_v42 }
 0x3b2   :  { %v308_v46 = vmul.f32 %v306_v43, %v242_v27  ;;  %v143_v27 = vadd.f32 %v871_v59, %v1106_v9 }
 0x41e   :  { %v311_v44 = vpop.permute.xlu0 %310 }
 0x41f   :  { %v313_v45 = vmul.f32 %v311_v44, %v306_v43 }
 0x421   :  { %315 = vrot.lane.b32.xlu1 %v313_v45, %s1032_s3 }
 0x493   :  { %v316_v47 = vpop.permute.xlu1 %315 }
 0x494   :  { %v318_v48 = vadd.f32 %v316_v47, %v308_v46 }
 0x496   :  { %966 = vtanh.f32 %v318_v48 }
 0x4a0   :  { %v967_v55 = vpop.eup %966 }
 0x4a1   :  { %321 = vrot.lane.b32.xlu0 %v967_v55, %s1031_s27 }
 0x513   :  { %v322_v56 = vpop.permute.xlu0 %321 }
 0x514   :  { %v1154_v57 = vmul.f32 %v322_v56, %v306_v43 }
 0x516   :  { %v325_v58 = vpack.c.bf16 %v1154_v57, %v1154_v57 }
 0x518   :  { %334 = vrot.lane.b32.xlu1 %v325_v58, %s1032_s3 }
 0x58a   :  { %v335_v1 = vpop.permute.xlu1 %334 }
 0x58b   :  { %899 = vmatmul.mubr.msk.bf16.vlgmr.msra.gmra.mrb[8].mxu0 %vm182_vm2, %v335_v1 }
 0x58c   :  { %911 = vmatpush3.bf16.msra.mxu0 %v1071_v4  ;;  %914 = vmatprep.mubr.msk.bf16.mxu0 %vm1029_vm1, %v1028_v2 }
 0x58d   :  { %912 = vmatprep.subr.bf16.mxu0 %v1028_v2 }
 0x590   :  { %913 = vmatpush3.bf16.msra.mxu0 %v1083_v6 }
 0x591   :  { %926 = vmatprep.subr.bf16.mxu0 %v1028_v2 }
 0x65e   :  { %v373_v5 = vpop.f32.mrb[8].mxu0 }
 0x65f   :  { %v379_v7 = vadd.f32 %v373_v5, %v138_v3  ;;  %v900_v8 = vpop.f32.mrb[9].mxu0 }
 0x660   :  { %v376_v10 = vpop.f32.mrb[10].mxu0 }
 0x661   :  { %968 = vtanh.f32 %v379_v7  ;;  %v901_v11 = vpop.f32.mrb[11].mxu0  ;;  %v380_v13 = vmul.f32 0.5, %v379_v7 }
 0x663   :  { %970 = vtanh.f32 %v380_v13 }
 0x66b   :  { %v969_v12 = vpop.eup %968 }
 0x66c   :  { %387 = vrot.lane.b32.xlu0 %v969_v12, %s1031_s27 }
 0x66d   :  { %v971_v14 = vpop.eup %970 }
 0x66e   :  { %v382_v15 = vadd.f32 1.0, %v971_v14  ;;  %v153_v14 = vadd.f32 %v1159_v61, %v1106_v9 }
 0x670   :  { %v383_v16 = vmul.f32 0.5, %v382_v15 }
 0x672   :  { %v385_v19 = vmul.f32 %v383_v16, %v318_v48 }
 0x6de   :  { %v388_v17 = vpop.permute.xlu0 %387 }
 0x6df   :  { %v390_v18 = vmul.f32 %v388_v17, %v383_v16 }
 0x6e1   :  { %392 = vrot.lane.b32.xlu1 %v390_v18, %s1032_s3 }
 0x753   :  { %v393_v20 = vpop.permute.xlu1 %392 }
 0x754   :  { %v395_v21 = vadd.f32 %v393_v20, %v385_v19 }
 0x756   :  { %972 = vtanh.f32 %v395_v21 }
 0x760   :  { %v973_v22 = vpop.eup %972 }
 0x761   :  { %398 = vrot.lane.b32.xlu0 %v973_v22, %s1031_s27 }
 0x7d3   :  { %v399_v23 = vpop.permute.xlu0 %398 }
 0x7d4   :  { %v1178_v24 = vmul.f32 %v399_v23, %v383_v16 }
 0x7d6   :  { %v402_v25 = vpack.c.bf16 %v1178_v24, %v1178_v24 }
 0x7d8   :  { %411 = vrot.lane.b32.xlu1 %v402_v25, %s1032_s3 }
 0x84a   :  { %v412_v26 = vpop.permute.xlu1 %411 }
 0x84b   :  { %907 = vmatmul.mubr.msk.bf16.vlgmr.msra.gmra.mrb[8].mxu1 %vm182_vm2, %v412_v26 }
 0x84c   :  { %919 = vmatpush3.bf16.msra.mxu1 %v1071_v4  ;;  %922 = vmatprep.mubr.msk.bf16.mxu1 %vm1029_vm1, %v1028_v2 }
 0x84d   :  { %920 = vmatprep.subr.bf16.mxu1 %v1028_v2 }
 0x850   :  { %921 = vmatpush3.bf16.msra.mxu1 %v1083_v6 }
 0x851   :  { %934 = vmatprep.subr.bf16.mxu1 %v1028_v2 }
 0x91e   :  { %v450_v28 = vpop.f32.mrb[8].mxu1 }
 0x91f   :  { %v456_v29 = vadd.f32 %v450_v28, %v143_v27  ;;  %v908_v31 = vpop.f32.mrb[9].mxu1 }
 0x920   :  { %v453_v32 = vpop.f32.mrb[10].mxu1 }
 0x921   :  { %974 = vtanh.f32 %v456_v29  ;;  %v909_v33 = vpop.f32.mrb[11].mxu1  ;;  %v457_v35 = vmul.f32 0.5, %v456_v29 }
 0x922   :  { %v158_v33 = vadd.f32 %v1106_v9, %v1165_v0 }
 0x923   :  { %976 = vtanh.f32 %v457_v35 }
 0x92b   :  { %v975_v34 = vpop.eup %974 }
 0x92c   :  { %464 = vrot.lane.b32.xlu0 %v975_v34, %s1031_s27 }
 0x92d   :  { %v977_v36 = vpop.eup %976 }
 0x92e   :  { %v459_v37 = vadd.f32 1.0, %v977_v36 }
 0x930   :  { %v460_v38 = vmul.f32 0.5, %v459_v37 }
 0x932   :  { %v462_v41 = vmul.f32 %v460_v38, %v395_v21 }
 0x99e   :  { %v465_v39 = vpop.permute.xlu0 %464 }
 0x99f   :  { %v467_v40 = vmul.f32 %v465_v39, %v460_v38 }
 0x9a1   :  { %469 = vrot.lane.b32.xlu1 %v467_v40, %s1032_s3 }
 0xa13   :  { %v470_v42 = vpop.permute.xlu1 %469 }
 0xa14   :  { %v472_v43 = vadd.f32 %v470_v42, %v462_v41 }
 0xa16   :  { %978 = vtanh.f32 %v472_v43 }
 0xa20   :  { %v979_v44 = vpop.eup %978 }
 0xa21   :  { %475 = vrot.lane.b32.xlu0 %v979_v44, %s1031_s27 }
 0xa93   :  { %v476_v45 = vpop.permute.xlu0 %475 }
 0xa94   :  { %v1194_v46 = vmul.f32 %v476_v45, %v460_v38 }
 0xa96   :  { %v479_v47 = vpack.c.bf16 %v1194_v46, %v1194_v46 }
 0xa98   :  { %488 = vrot.lane.b32.xlu1 %v479_v47, %s1032_s3 }
 0xb0a   :  { %v489_v48 = vpop.permute.xlu1 %488 }
 0xb0b   :  { %915 = vmatmul.mubr.msk.bf16.vlgmr.msra.gmra.mrb[12].mxu0 %vm182_vm2, %v489_v48 }
 0xb0c   :  { %927 = vmatpush3.bf16.msra.mxu0 %v1071_v4  ;;  %930 = vmatprep.mubr.msk.bf16.mxu0 %vm1029_vm1, %v1028_v2 }
 0xb0d   :  { %928 = vmatprep.subr.bf16.mxu0 %v1028_v2 }
 0xb10   :  { %929 = vmatpush3.bf16.msra.mxu0 %v1083_v6 }
 0xbde   :  { %v527_v50 = vpop.f32.mrb[12].mxu0 }
 0xbdf   :  { %v533_v51 = vadd.f32 %v527_v50, %v148_v49  ;;  %v916_v52 = vpop.f32.mrb[13].mxu0 }
 0xbe0   :  { %v530_v53 = vpop.f32.mrb[14].mxu0 }
 0xbe1   :  { %980 = vtanh.f32 %v533_v51  ;;  %v917_v54 = vpop.f32.mrb[15].mxu0  ;;  %v534_v56 = vmul.f32 0.5, %v533_v51 }
 0xbe2   :  { %v163_v54 = vadd.f32 %v1163_v63, %v1106_v9 }
 0xbe3   :  { %982 = vtanh.f32 %v534_v56 }
 0xbeb   :  { %v981_v55 = vpop.eup %980 }
 0xbec   :  { %541 = vrot.lane.b32.xlu0 %v981_v55, %s1031_s27 }
 0xbed   :  { %v983_v58 = vpop.eup %982 }
 0xbee   :  { %v536_v59 = vadd.f32 1.0, %v983_v58 }
 0xbf0   :  { %v537_v60 = vmul.f32 0.5, %v536_v59 }
 0xbf2   :  { %v539_v5 = vmul.f32 %v537_v60, %v472_v43 }
 0xc5e   :  { %v542_v1 = vpop.permute.xlu0 %541 }
 0xc5f   :  { %v544_v3 = vmul.f32 %v542_v1, %v537_v60 }
 0xc61   :  { %546 = vrot.lane.b32.xlu1 %v544_v3, %s1032_s3 }
 0xcd3   :  { %v547_v62 = vpop.permute.xlu1 %546 }
 0xcd4   :  { %v549_v7 = vadd.f32 %v547_v62, %v539_v5 }
 0xcd6   :  { %984 = vtanh.f32 %v549_v7 }
 0xce0   :  { %v985_v8 = vpop.eup %984 }
 0xce1   :  { %552 = vrot.lane.b32.xlu0 %v985_v8, %s1031_s27 }
 0xd53   :  { %v553_v10 = vpop.permute.xlu0 %552 }
 0xd54   :  { %v1210_v11 = vmul.f32 %v553_v10, %v537_v60 }
 0xd56   :  { %v556_v12 = vpack.c.bf16 %v1210_v11, %v1210_v11 }
 0xd58   :  { %565 = vrot.lane.b32.xlu1 %v556_v12, %s1032_s3 }
 0xdca   :  { %v566_v13 = vpop.permute.xlu1 %565 }
 0xdcb   :  { %923 = vmatmul.mubr.msk.bf16.vlgmr.msra.gmra.mrb[12].mxu1 %vm182_vm2, %v566_v13 }
 0xdcc   :  { %935 = vmatpush3.bf16.msra.mxu1 %v1071_v4  ;;  %938 = vmatprep.mubr.msk.bf16.mxu1 %vm1029_vm1, %v1028_v2 }
 0xdcd   :  { %936 = vmatprep.subr.bf16.mxu1 %v1028_v2 }
 0xdd0   :  { %937 = vmatpush3.bf16.msra.mxu1 %v1083_v6 }
 0xe9e   :  { %v604_v15 = vpop.f32.mrb[12].mxu1 }
 0xe9f   :  { %v610_v16 = vadd.f32 %v604_v15, %v153_v14  ;;  %v924_v17 = vpop.f32.mrb[13].mxu1 }
 0xea0   :  { %v607_v18 = vpop.f32.mrb[14].mxu1 }
 0xea1   :  { %986 = vtanh.f32 %v610_v16  ;;  %v925_v19 = vpop.f32.mrb[15].mxu1  ;;  %v611_v4 = vmul.f32 0.5, %v610_v16 }
 0xea3   :  { %988 = vtanh.f32 %v611_v4 }
 0xeab   :  { %v987_v20 = vpop.eup %986 }
 0xeac   :  { %618 = vrot.lane.b32.xlu0 %v987_v20, %s1031_s27 }
 0xead   :  { %v989_v21 = vpop.eup %988 }
 0xeae   :  { %v613_v22 = vadd.f32 1.0, %v989_v21 }
 0xeb0   :  { %v614_v23 = vmul.f32 0.5, %v613_v22 }
 0xeb2   :  { %v616_v6 = vmul.f32 %v614_v23, %v549_v7 }
 0xf1e   :  { %v619_v2 = vpop.permute.xlu0 %618 }
 0xf1f   :  { %v621_v25 = vmul.f32 %v619_v2, %v614_v23 }
 0xf21   :  { %623 = vrot.lane.b32.xlu1 %v621_v25, %s1032_s3 }
 0xf93   :  { %v624_v61 = vpop.permute.xlu1 %623 }
 0xf94   :  { %v626_v26 = vadd.f32 %v624_v61, %v616_v6 }
 0xf96   :  { %990 = vtanh.f32 %v626_v26 }
 0xfa0   :  { %v991_v27 = vpop.eup %990 }
 0xfa1   :  { %629 = vrot.lane.b32.xlu0 %v991_v27, %s1031_s27 }
0x1013   :  { %v630_v28 = vpop.permute.xlu0 %629 }
0x1014   :  { %v1226_v29 = vmul.f32 %v630_v28, %v614_v23 }
0x1016   :  { %v633_v31 = vpack.c.bf16 %v1226_v29, %v1226_v29 }
0x1018   :  { %642 = vrot.lane.b32.xlu1 %v633_v31, %s1032_s3 }
0x108a   :  { %v643_v32 = vpop.permute.xlu1 %642 }
0x108b   :  { %931 = vmatmul.mubr.msk.bf16.vlgmr.msra.gmra.mrb[16].mxu0 %vm182_vm2, %v643_v32 }
0x115e   :  { %v681_v34 = vpop.f32.mrb[16].mxu0 }
0x115f   :  { %v687_v35 = vadd.f32 %v681_v34, %v158_v33  ;;  %v932_v36 = vpop.f32.mrb[17].mxu0 }
0x1160   :  { %v684_v37 = vpop.f32.mrb[18].mxu0 }
0x1161   :  { %992 = vtanh.f32 %v687_v35  ;;  %v933_v38 = vpop.f32.mrb[19].mxu0  ;;  %v688_v40 = vmul.f32 0.5, %v687_v35 }
0x1163   :  { %994 = vtanh.f32 %v688_v40 }
0x116b   :  { %v993_v39 = vpop.eup %992 }
0x116c   :  { %695 = vrot.lane.b32.xlu0 %v993_v39, %s1031_s27 }
0x116d   :  { %v995_v41 = vpop.eup %994 }
0x116e   :  { %v690_v42 = vadd.f32 1.0, %v995_v41 }
0x1170   :  { %v691_v43 = vmul.f32 0.5, %v690_v42 }
0x1172   :  { %v693_v47 = vmul.f32 %v691_v43, %v626_v26 }
0x11de   :  { %v696_v44 = vpop.permute.xlu0 %695 }
0x11df   :  { %v698_v45 = vmul.f32 %v696_v44, %v691_v43 }
0x11e1   :  { %700 = vrot.lane.b32.xlu1 %v698_v45, %s1032_s3 }
0x1253   :  { %v701_v0 = vpop.permute.xlu1 %700 }
0x1254   :  { %v703_v48 = vadd.f32 %v701_v0, %v693_v47 }
0x1256   :  { %996 = vtanh.f32 %v703_v48 }
0x1260   :  { %v997_v49 = vpop.eup %996 }
0x1261   :  { %706 = vrot.lane.b32.xlu0 %v997_v49, %s1031_s27 }
0x12d3   :  { %v707_v50 = vpop.permute.xlu0 %706 }
0x12d4   :  { %v709_v51 = vmul.f32 %v707_v50, %v691_v43 }
0x12d6   :  { %v710_v52 = vpack.c.bf16 %v709_v51, %v709_v51 }
0x12d8   :  { %719 = vrot.lane.b32.xlu1 %v710_v52, %s1032_s3 }
0x134a   :  { %v720_v53 = vpop.permute.xlu1 %719 }
0x134b   :  { %939 = vmatmul.mubr.msk.bf16.vlgmr.msra.gmra.mrb[16].mxu1 %vm182_vm2, %v720_v53 }
0x141e   :  { %v758_v55 = vpop.f32.mrb[16].mxu1 }
0x141f   :  { %v764_v56 = vadd.f32 %v758_v55, %v163_v54  ;;  %v940_v58 = vpop.f32.mrb[17].mxu1 }
0x1420   :  { %v761_v59 = vpop.f32.mrb[18].mxu1 }
0x1421   :  { %998 = vtanh.f32 %v764_v56  ;;  %v941_v60 = vpop.f32.mrb[19].mxu1  ;;  %v765_v3 = vmul.f32 0.5, %v764_v56 }
0x1423   :  { %1000 = vtanh.f32 %v765_v3 }
0x142b   :  { %v999_v1 = vpop.eup %998 }
0x142c   :  { %772 = vrot.lane.b32.xlu0 %v999_v1, %s1031_s27 }
0x142d   :  { %v1001_v5 = vpop.eup %1000 }
0x142e   :  { %v767_v62 = vadd.f32 1.0, %v1001_v5 }
0x1430   :  { %v768_v7 = vmul.f32 0.5, %v767_v62 }
0x1432   :  { %v770_v9 = vmul.f32 %v768_v7, %v703_v48 }
0x149e   :  { %v773_v8 = vpop.permute.xlu0 %772 }
0x149f   :  { %v775_v10 = vmul.f32 %v773_v8, %v768_v7 }
0x14a1   :  { %777 = vrot.lane.b32.xlu1 %v775_v10, %s1032_s3 }
0x14a5   :  { %251 = vrot.lane.b32.xlu1 %v1112_v30, %s1032_s3 }
0x14a9   :  { %404 = vrot.lane.b32.xlu1 %v1178_v24, %s1032_s3 }
0x14ad   :  { %558 = vrot.lane.b32.xlu1 %v1210_v11, %s1032_s3 }
0x14b1   :  { %712 = vrot.lane.b32.xlu1 %v709_v51, %s1032_s3 }
0x1513   :  { %v778_v63 = vpop.permute.xlu1 %777 }
0x1514   :  { %v780_v12 = vadd.f32 %v778_v63, %v770_v9 }
0x1516   :  { %1002 = vtanh.f32 %v780_v12 }
0x1517   :  { %v252_v13 = vpop.permute.xlu1 %251 }
0x1518   :  { %v254_v14 = vsel %vm182_vm2, %v252_v13, 0.0 }
0x1519   :  { %255 = vst [vmem:[#allocation2] sm:$0xff] %v254_v14 }
0x151b   :  { %v405_v15 = vpop.permute.xlu1 %404 }
0x151c   :  { %v407_v16 = vsel %vm182_vm2, %v405_v15, 0.0 }
0x151d   :  { %409 = vst [vmem:[#allocation2 + $0x10] sm:$0xff] %v407_v16 }
0x151f   :  { %v559_v30 = vpop.permute.xlu1 %558 }
0x1520   :  { %v1003_v17 = vpop.eup %1002  ;;  %v561_v24 = vsel %vm182_vm2, %v559_v30, 0.0 }
0x1521   :  { %563 = vst [vmem:[#allocation2 + $0x20] sm:$0xff] %v561_v24  ;;  %783 = vrot.lane.b32.xlu0 %v1003_v17, %s1031_s27 }
0x1523   :  { %v713_v11 = vpop.permute.xlu1 %712 }
0x1524   :  { %v715_v18 = vsel %vm182_vm2, %v713_v11, 0.0 }
0x1525   :  { %717 = vst [vmem:[#allocation2 + $0x30] sm:$0xff] %v715_v18  ;;  %327 = vrot.lane.b32.xlu0 %v1154_v57, %s1032_s3 }
0x1529   :  { %481 = vrot.lane.b32.xlu0 %v1194_v46, %s1032_s3 }
0x152d   :  { %635 = vrot.lane.b32.xlu0 %v1226_v29, %s1032_s3 }
0x1593   :  { %v784_v19 = vpop.permute.xlu0 %783 }
0x1594   :  { %v786_v20 = vmul.f32 %v784_v19, %v768_v7 }
0x1596   :  { %788 = vrot.lane.b32.xlu0 %v786_v20, %s1032_s3 }
0x1597   :  { %v328_v4 = vpop.permute.xlu0 %327 }
0x1598   :  { %v330_v21 = vsel %vm182_vm2, %v328_v4, 0.0 }
0x1599   :  { %332 = vst [vmem:[#allocation2 + $0x8] sm:$0xff] %v330_v21 }
0x159b   :  { %v482_v22 = vpop.permute.xlu0 %481 }
0x159c   :  { %v484_v23 = vsel %vm182_vm2, %v482_v22, 0.0 }
0x159d   :  { %486 = vst [vmem:[#allocation2 + $0x18] sm:$0xff] %v484_v23 }
0x159f   :  { %v636_v2 = vpop.permute.xlu0 %635 }
0x15a0   :  { %v638_v57 = vsel %vm182_vm2, %v636_v2, 0.0 }
0x15a1   :  { %640 = vst [vmem:[#allocation2 + $0x28] sm:$0xff] %v638_v57 }
0x1608   :  { %v789_v46 = vpop.permute.xlu0 %788 }
0x1609   :  { %v791_v25 = vsel %vm182_vm2, %v789_v46, 0.0 }
0x160a   :  { %793 = vst [vmem:[#allocation2 + $0x38] sm:$0xff] %v791_v25 }
0x160b   :  { %1015 = shalt.err (!%p1012_p4)
}
0x160c   :  { %s1016_s18 = scalar_lea.hbm %s1282_s4, 1024 }
0x160d   :  { %p1017_p5 = scmp.ne.s32.totalorder %s1282_s4, %s1016_s18  ;;  %p1020_p6 = scmp.lt.u32.totalorder %s1016_s18, %s1282_s4 }
0x160f   :  { %p1022_p7 = pnand %p1020_p6, %p1017_p5 }
0x1611   :  { %1025 = shalt.err (!%p1022_p7)
}
0x1612   :  { %s1034_s1 = smov 128   ;;  %s1035_s23 = smov 8  }
0x1613   :  { %805 = dma.vmem_to_hbm [thread:$0]  %s800_s14, 1024, %s1282_s4, [#allocation3], %s1034_s1, %s1034_s1, %s1035_s23  }
0x1614   :  { %1026 = dma.done.wait [#allocation3], 1024  }
0x1615   :  { %1027 = vsyncadd [#allocation3], 4294966272 }
0x1616   :  { %809 = vsyncpa [#allocation3], 1 }

</bundles_post_ra>
